<compile_context>
chip_gen: v6e
topology: v6e:2x2x1
jax: 0.10.0
libtpu: 0.0.40
codegen_flags: <defaults>
</compile_context>

<pallas_src>
import functools

import jax
import jax.numpy as jnp
from jax import lax
from jax.experimental import pallas as pl
from jax.experimental.pallas import tpu as pltpu


def _infonce_kernel(img_ref, txt_hbm_ref, loss_ref,
                    txt_raw_ref, txt_nf_ref, dma_sem,
                    colmax_ref, colsum_ref, rowlse_ref, diag_ref,
                    *, temperature, mxu_dtype, use_fixed_shift):
    i = pl.program_id(0)
    nt = pl.num_programs(0)
    tm = img_ref.shape[0]
    B = txt_nf_ref.shape[0]

    eps = 1e-8
    inv_t = 1.0 / temperature

    @pl.when(i == 0)
    def _init():
        # One-time: DMA the full text features HBM -> VMEM, normalize once,
        # cache in mxu_dtype.  Hoists all O(B*D) text-side VPU work out of the
        # per-tile loop (it used to be repeated nt times).
        cp = pltpu.make_async_copy(txt_hbm_ref, txt_raw_ref, dma_sem)
        cp.start()
        cp.wait()
        txt = txt_raw_ref[...].astype(jnp.float32)                       # [B, D]
        # Per-vector clamp (differs from the reference's product clamp only for
        # ~zero vectors) — intentional.
        txt_inv = lax.rsqrt(
            jnp.maximum(jnp.sum(txt * txt, axis=-1, keepdims=True), eps * eps))
        txt_nf_ref[...] = (txt * txt_inv).astype(txt_nf_ref.dtype)       # [B, D]
        colsum_ref[...] = jnp.zeros_like(colsum_ref)
        rowlse_ref[...] = jnp.zeros_like(rowlse_ref)
        diag_ref[...] = jnp.zeros_like(diag_ref)
        if not use_fixed_shift:
            colmax_ref[...] = jnp.full_like(colmax_ref, -jnp.inf)

    # Per-tile image normalization; fold 1/temperature into the image operand so
    # no [tm,B] divide / outer-product denominator is ever formed.
    img = img_ref[...].astype(jnp.float32)                               # [tm, D]
    img_inv = lax.rsqrt(
        jnp.maximum(jnp.sum(img * img, axis=-1, keepdims=True), eps * eps))
    img_nf = img * (img_inv * inv_t)                                     # [tm, D]

    txt_nf = txt_nf_ref[...]                                             # [B, D] (mxu_dtype)

    # A.B^T contraction on the MXU (no transpose materialized), f32 accumulation.
    logits = lax.dot_general(
        img_nf.astype(mxu_dtype), txt_nf,
        dimension_numbers=(((1,), (1,)), ((), ())),
        preferred_element_type=jnp.float32)                              # [tm, B]

    # Diagonal (positive-pair) logits from the cached normalized text slice.
    start = pl.multiple_of(i * tm, tm)
    txt_blk = txt_nf_ref[pl.ds(start, tm), :].astype(jnp.float32)        # [tm, D]
    diag = jnp.sum(img_nf * txt_blk, axis=-1, keepdims=True)             # [tm, 1]

    if use_fixed_shift:
        # Cosine logits are bounded by +-1/T, so a constant 1/T shift is a valid
        # (max-free) stabilizer: a single [tm,B] exp feeds both loss directions
        # and the cross-tile column reduction is purely additive.
        p = jnp.exp(logits - inv_t)                                      # [tm, B]
        lse_row = jnp.log(jnp.sum(p, axis=-1, keepdims=True)) + inv_t    # [tm, 1]
        colsum_ref[...] += jnp.sum(p, axis=0, keepdims=True)             # [1, B]
    else:
        # Fallback online-max path for very small temperatures (exp(-2/T) would
        # underflow f32 under the fixed-shift variant).
        row_max = jnp.max(logits, axis=-1, keepdims=True)                # [tm, 1]
        p = jnp.exp(logits - row_max)                                    # [tm, B]
        lse_row = jnp.log(jnp.sum(p, axis=-1, keepdims=True)) + row_max  # [tm, 1]
        m_old = colmax_ref[...]                                          # [1, B]
        m_new = jnp.maximum(m_old, jnp.max(logits, axis=0, keepdims=True))
        colsum_ref[...] = (colsum_ref[...] * jnp.exp(m_old - m_new)
                           + jnp.sum(jnp.exp(logits - m_new), axis=0, keepdims=True))
        colmax_ref[...] = m_new

    rowlse_ref[...] += jnp.sum(lse_row, keepdims=True)                   # (1, 1)
    diag_ref[...] += jnp.sum(diag, keepdims=True)                        # (1, 1)

    @pl.when(i == nt - 1)
    def _finalize():
        if use_fixed_shift:
            lse_col = jnp.log(colsum_ref[...]) + inv_t                   # [1, B]
        else:
            lse_col = jnp.log(colsum_ref[...]) + colmax_ref[...]         # [1, B]
        sum_lse_col = jnp.sum(lse_col, keepdims=True)                    # (1, 1)
        d = diag_ref[...]                     # sum(diag) shared by both directions
        loss_img = (rowlse_ref[...] - d) * (1.0 / B)
        loss_txt = (sum_lse_col - d) * (1.0 / B)
        loss_ref[...] = (loss_img + loss_txt) * 0.5


def _pick_row_tile(B: int, max_tile: int = 256) -> int:
    """Largest row tile <= max_tile that divides B (full-B fallback keeps blocks legal)."""
    if B <= max_tile:
        return B
    for tm in (256, 128, 64, 32, 16, 8):
        if tm <= max_tile and B % tm == 0:
            return tm
    # TODO(synk): pad B / mask the last tile instead of this full-B fallback.
    return B


def _vmem_limit_bytes(B: int, D: int, tm: int, in_dtype, mxu_dtype) -> int:
    """Rough per-shape VMEM budget (replaces a hard-coded cap; works on 64 MiB v7x)."""
    in_b = jnp.dtype(in_dtype).itemsize
    mxu_b = jnp.dtype(mxu_dtype).itemsize
    lane_b = max(B, 128)
    est = (2 * tm * D * in_b          # double-buffered image row tiles
           + B * D * in_b             # one-time raw-text staging scratch
           + B * D * mxu_b            # cached normalized text (single copy)
           + 16 * lane_b * 4          # column accumulators (sublane-padded)
           + 6 * tm * lane_b * 4      # logits / exp / reduction temporaries
           + (2 << 20))               # misc headroom
    est = int(est * 1.25)
    return min(max(est, 16 << 20), 120 << 20)


def infonce_loss(img_features, txt_features, temperature: float = 0.07,
                 mxu_dtype=jnp.bfloat16):
    """Pallas TPU implementation of InfoNCELoss.forward."""
    B, D = img_features.shape
    assert txt_features.shape == (B, D)

    tm = _pick_row_tile(B)
    nt = B // tm
    use_fixed_shift = (1.0 / float(temperature)) <= 40.0

    kernel = functools.partial(_infonce_kernel,
                               temperature=float(temperature),
                               mxu_dtype=mxu_dtype,
                               use_fixed_shift=use_fixed_shift)

    out = pl.pallas_call(
        kernel,
        out_shape=jax.ShapeDtypeStruct((1, 1), jnp.float32),
        grid_spec=pltpu.PrefetchScalarGridSpec(
            num_scalar_prefetch=0,
            grid=(nt,),
            in_specs=[
                pl.BlockSpec((tm, D), lambda i: (i, 0)),   # streamed image row tiles
                pl.BlockSpec(memory_space=pl.ANY),         # full text feats stay in HBM
            ],
            out_specs=pl.BlockSpec((1, 1), lambda i: (0, 0)),
            scratch_shapes=[
                pltpu.VMEM((B, D), txt_features.dtype),  # raw-text staging (one DMA)
                pltpu.VMEM((B, D), mxu_dtype),           # cached normalized text
                pltpu.SemaphoreType.DMA,                 # semaphore for the one-time DMA
                pltpu.VMEM((1, B), jnp.float32),         # column max (fallback path only)
                pltpu.VMEM((1, B), jnp.float32),         # running column sum(exp)
                pltpu.VMEM((1, 1), jnp.float32),         # accumulated row-direction LSE
                pltpu.VMEM((1, 1), jnp.float32),         # accumulated diagonal logits
            ],
        ),
        compiler_params=pltpu.CompilerParams(
            # The single grid axis carries the online column reduction, so it must
            # run sequentially.
            dimension_semantics=("arbitrary",),
            vmem_limit_bytes=_vmem_limit_bytes(B, D, tm, img_features.dtype, mxu_dtype),
        ),
    )(img_features, txt_features)
    return out[0, 0]


def _reference_infonce(img, txt, temperature=0.07):
    """Pure-JAX reference mirroring the PyTorch module semantics (f32)."""
    img = img.astype(jnp.float32)
    txt = txt.astype(jnp.float32)
    img_n = jnp.sqrt(jnp.sum(img * img, axis=-1, keepdims=True))
    txt_n = jnp.sqrt(jnp.sum(txt * txt, axis=-1, keepdims=True))
    logits = (img @ txt.T) / jnp.maximum(img_n * txt_n.T, 1e-8) / temperature
    labels = jnp.arange(img.shape[0])
    log_p_row = logits - jax.scipy.special.logsumexp(logits, axis=1, keepdims=True)
    loss_img = -jnp.mean(log_p_row[labels, labels])
    log_p_col = logits - jax.scipy.special.logsumexp(logits, axis=0, keepdims=True)
    loss_txt = -jnp.mean(log_p_col[labels, labels])
    return (loss_img + loss_txt) / 2


if __name__ == "__main__":
    key = jax.random.PRNGKey(0)
    k_img, k_txt = jax.random.split(key)

    B, D = 8, 32  # small shapes consistent with the module; full-array blocks
    img_features = jax.random.normal(k_img, (B, D), dtype=jnp.float32)
    txt_features = jax.random.normal(k_txt, (B, D), dtype=jnp.float32)

    ref = _reference_infonce(img_features, txt_features, temperature=0.07)

    # Default path: bf16 MXU operands, f32 accumulation / softmax.
    loss_bf16 = infonce_loss(img_features, txt_features, temperature=0.07)
    loss_bf16 = jax.block_until_ready(loss_bf16)
    assert jnp.allclose(loss_bf16, ref, rtol=5e-2, atol=5e-2), (loss_bf16, ref)

    # f32 MXU operands: tighter check of the restructured math.
    loss_f32 = infonce_loss(img_features, txt_features, temperature=0.07,
                            mxu_dtype=jnp.float32)
    loss_f32 = jax.block_until_ready(loss_f32)
    assert jnp.allclose(loss_f32, ref, rtol=2e-2, atol=2e-2), (loss_f32, ref)

    print("KERNEL_OK")
</pallas_src>

<mosaic_0001>
module attributes {stable_mosaic.version = 11 : i64} {
  func.func @_infonce_kernel(%arg0: i32, %arg1: memref<8x32xf32, #tpu.memory_space<vmem>>, %arg2: memref<8x32xf32, #tpu.memory_space<any>>, %arg3: memref<1x1xf32, #tpu.memory_space<vmem>>, %arg4: memref<8x32xf32, #tpu.memory_space<vmem>>, %arg5: memref<8x32xbf16, #tpu.memory_space<vmem>>, %arg6: memref<!tpu.dma_semaphore, #tpu.memory_space<semaphore_mem>>, %arg7: memref<1x8xf32, #tpu.memory_space<vmem>>, %arg8: memref<1x8xf32, #tpu.memory_space<vmem>>, %arg9: memref<1x1xf32, #tpu.memory_space<vmem>>, %arg10: memref<1x1xf32, #tpu.memory_space<vmem>>) attributes {dimension_semantics = [#tpu.dimension_semantics<arbitrary>], iteration_bounds = array<i64: 1>, scalar_prefetch = 0 : i64, scratch_operands = 7 : i64, tpu.core_type = #tpu.core_type<tc>, window_params = [{transform_indices = @transform_0, window_bounds = array<i64: 8, 32>}, {}, {pipeline_mode = #tpu.pipeline_mode<synchronous>, transform_indices = @transform_2, window_bounds = array<i64: 1, 1>}]} {
    %c0_i32 = arith.constant 0 : i32
    %0 = arith.cmpi eq, %arg0, %c0_i32 : i32
    %1 = arith.extui %0 : i1 to i32
    %c0_i32_0 = arith.constant 0 : i32
    %2 = arith.cmpi ne, %1, %c0_i32_0 : i32
    scf.if %2 {
      tpu.enqueue_dma source(%arg2 : memref<8x32xf32, #tpu.memory_space<any>>) target(%arg4 : memref<8x32xf32, #tpu.memory_space<vmem>>) target_semaphore(%arg6 : memref<!tpu.dma_semaphore, #tpu.memory_space<semaphore_mem>>)
      tpu.wait_dma2 semaphore(%arg6 : memref<!tpu.dma_semaphore, #tpu.memory_space<semaphore_mem>>) src(%arg2 : memref<8x32xf32, #tpu.memory_space<any>>) dst(%arg4 : memref<8x32xf32, #tpu.memory_space<vmem>>)
      %c0_29 = arith.constant 0 : index
      %c0_30 = arith.constant 0 : index
      %57 = vector.load %arg4[%c0_29, %c0_30] : memref<8x32xf32, #tpu.memory_space<vmem>>, vector<8x32xf32>
      %58 = arith.mulf %57, %57 : vector<8x32xf32>
      %cst_31 = arith.constant dense<0.000000e+00> : vector<8xf32>
      %59 = vector.multi_reduction <add>, %58, %cst_31 [1] : vector<8x32xf32> to vector<8xf32>
      %60 = vector.shape_cast %59 : vector<8xf32> to vector<8x1xf32>
      %cst_32 = arith.constant 1.000000e-16 : f32
      %61 = vector.broadcast %cst_32 : f32 to vector<8x1xf32>
      %62 = arith.maximumf %60, %61 : vector<8x1xf32>
      %63 = math.rsqrt %62 : vector<8x1xf32>
      %64 = vector.broadcast %63 : vector<8x1xf32> to vector<8x32xf32>
      %65 = arith.mulf %57, %64 : vector<8x32xf32>
      %66 = arith.truncf %65 : vector<8x32xf32> to vector<8x32xbf16>
      %c0_33 = arith.constant 0 : index
      %c0_34 = arith.constant 0 : index
      %67 = vector.load %arg5[%c0_33, %c0_34] : memref<8x32xbf16, #tpu.memory_space<vmem>>, vector<8x32xbf16>
      tpu.vector_store %arg5[%c0_33, %c0_34], %66 {strides = array<i32>} : memref<8x32xbf16, #tpu.memory_space<vmem>>, vector<8x32xbf16>,
      %cst_35 = arith.constant 0.000000e+00 : f32
      %68 = vector.broadcast %cst_35 : f32 to vector<1x8xf32>
      %c0_36 = arith.constant 0 : index
      %c0_37 = arith.constant 0 : index
      %69 = vector.load %arg8[%c0_36, %c0_37] : memref<1x8xf32, #tpu.memory_space<vmem>>, vector<1x8xf32>
      tpu.vector_store %arg8[%c0_36, %c0_37], %68 {strides = array<i32>} : memref<1x8xf32, #tpu.memory_space<vmem>>, vector<1x8xf32>,
      %cst_38 = arith.constant 0.000000e+00 : f32
      %70 = vector.broadcast %cst_38 : f32 to vector<1x1xf32>
      %c0_39 = arith.constant 0 : index
      %c0_40 = arith.constant 0 : index
      %71 = vector.load %arg9[%c0_39, %c0_40] : memref<1x1xf32, #tpu.memory_space<vmem>>, vector<1x1xf32>
      tpu.vector_store %arg9[%c0_39, %c0_40], %70 {strides = array<i32>} : memref<1x1xf32, #tpu.memory_space<vmem>>, vector<1x1xf32>,
      %cst_41 = arith.constant 0.000000e+00 : f32
      %72 = vector.broadcast %cst_41 : f32 to vector<1x1xf32>
      %c0_42 = arith.constant 0 : index
      %c0_43 = arith.constant 0 : index
      %73 = vector.load %arg10[%c0_42, %c0_43] : memref<1x1xf32, #tpu.memory_space<vmem>>, vector<1x1xf32>
      tpu.vector_store %arg10[%c0_42, %c0_43], %72 {strides = array<i32>} : memref<1x1xf32, #tpu.memory_space<vmem>>, vector<1x1xf32>,
    } else {
    }
    %c0 = arith.constant 0 : index
    %c0_1 = arith.constant 0 : index
    %3 = vector.load %arg1[%c0, %c0_1] : memref<8x32xf32, #tpu.memory_space<vmem>>, vector<8x32xf32>
    %4 = arith.mulf %3, %3 : vector<8x32xf32>
    %cst = arith.constant dense<0.000000e+00> : vector<8xf32>
    %5 = vector.multi_reduction <add>, %4, %cst [1] : vector<8x32xf32> to vector<8xf32>
    %6 = vector.shape_cast %5 : vector<8xf32> to vector<8x1xf32>
    %cst_2 = arith.constant 1.000000e-16 : f32
    %7 = vector.broadcast %cst_2 : f32 to vector<8x1xf32>
    %8 = arith.maximumf %6, %7 : vector<8x1xf32>
    %9 = math.rsqrt %8 : vector<8x1xf32>
    %cst_3 = arith.constant 14.2857141 : f32
    %10 = vector.broadcast %cst_3 : f32 to vector<8x1xf32>
    %11 = arith.mulf %9, %10 : vector<8x1xf32>
    %12 = vector.broadcast %11 : vector<8x1xf32> to vector<8x32xf32>
    %13 = arith.mulf %3, %12 : vector<8x32xf32>
    %c0_4 = arith.constant 0 : index
    %c0_5 = arith.constant 0 : index
    %14 = vector.load %arg5[%c0_4, %c0_5] : memref<8x32xbf16, #tpu.memory_space<vmem>>, vector<8x32xbf16>
    %15 = arith.truncf %13 : vector<8x32xf32> to vector<8x32xbf16>
    %cst_6 = arith.constant dense<0.000000e+00> : vector<8x8xf32>
    %16 = tpu.matmul %15, %14, %cst_6 {dimension_numbers = #tpu.dot_dimension_numbers<[1], [1], [0], [0], [0, 0, 1, 0], [], []>} : vector<8x32xbf16>, vector<8x32xbf16>, vector<8x8xf32> -> vector<8x8xf32>
    %c8_i32 = arith.constant 8 : i32
    %17 = arith.muli %arg0, %c8_i32 : i32
    %18 = tpu.assume_multiple %17, 8 : i32
    %19 = arith.index_cast %18 : i32 to index
    %c0_7 = arith.constant 0 : index
    %20 = vector.load %arg5[%19, %c0_7] : memref<8x32xbf16, #tpu.memory_space<vmem>>, vector<8x32xbf16>
    %21 = arith.extf %20 : vector<8x32xbf16> to vector<8x32xf32>
    %22 = arith.mulf %13, %21 : vector<8x32xf32>
    %cst_8 = arith.constant dense<0.000000e+00> : vector<8xf32>
    %23 = vector.multi_reduction <add>, %22, %cst_8 [1] : vector<8x32xf32> to vector<8xf32>
    %24 = vector.shape_cast %23 : vector<8xf32> to vector<8x1xf32>
    %cst_9 = arith.constant 14.2857141 : f32
    %25 = vector.broadcast %cst_9 : f32 to vector<8x8xf32>
    %26 = arith.subf %16, %25 : vector<8x8xf32>
    %27 = math.exp %26 : vector<8x8xf32>
    %cst_10 = arith.constant dense<0.000000e+00> : vector<8xf32>
    %28 = vector.multi_reduction <add>, %27, %cst_10 [1] : vector<8x8xf32> to vector<8xf32>
    %29 = vector.shape_cast %28 : vector<8xf32> to vector<8x1xf32>
    %30 = math.log %29 : vector<8x1xf32>
    %cst_11 = arith.constant 14.2857141 : f32
    %31 = vector.broadcast %cst_11 : f32 to vector<8x1xf32>
    %32 = arith.addf %30, %31 : vector<8x1xf32>
    %c0_12 = arith.constant 0 : index
    %c0_13 = arith.constant 0 : index
    %33 = vector.load %arg8[%c0_12, %c0_13] : memref<1x8xf32, #tpu.memory_space<vmem>>, vector<1x8xf32>
    %cst_14 = arith.constant dense<0.000000e+00> : vector<8xf32>
    %34 = vector.multi_reduction <add>, %27, %cst_14 [0] : vector<8x8xf32> to vector<8xf32>
    %35 = vector.shape_cast %34 : vector<8xf32> to vector<1x8xf32>
    %36 = arith.addf %33, %35 : vector<1x8xf32>
    %c0_15 = arith.constant 0 : index
    %c0_16 = arith.constant 0 : index
    %37 = vector.load %arg8[%c0_15, %c0_16] : memref<1x8xf32, #tpu.memory_space<vmem>>, vector<1x8xf32>
    tpu.vector_store %arg8[%c0_15, %c0_16], %36 {strides = array<i32>} : memref<1x8xf32, #tpu.memory_space<vmem>>, vector<1x8xf32>,
    %c0_17 = arith.constant 0 : index
    %c0_18 = arith.constant 0 : index
    %38 = vector.load %arg9[%c0_17, %c0_18] : memref<1x1xf32, #tpu.memory_space<vmem>>, vector<1x1xf32>
    %39 = vector.shape_cast %32 : vector<8x1xf32> to vector<1x8x1xf32>
    %cst_19 = arith.constant dense<0.000000e+00> : vector<1xf32>
    %40 = vector.multi_reduction <add>, %39, %cst_19 [1, 2] : vector<1x8x1xf32> to vector<1xf32>
    %41 = vector.shape_cast %40 : vector<1xf32> to vector<1x1x1xf32>
    %42 = vector.extract %41[0, 0, 0] : f32 from vector<1x1x1xf32>
    %43 = vector.broadcast %42 : f32 to vector<1x1xf32>
    %44 = arith.addf %38, %43 : vector<1x1xf32>
    %c0_20 = arith.constant 0 : index
    %c0_21 = arith.constant 0 : index
    %45 = vector.load %arg9[%c0_20, %c0_21] : memref<1x1xf32, #tpu.memory_space<vmem>>, vector<1x1xf32>
    tpu.vector_store %arg9[%c0_20, %c0_21], %44 {strides = array<i32>} : memref<1x1xf32, #tpu.memory_space<vmem>>, vector<1x1xf32>,
    %c0_22 = arith.constant 0 : index
    %c0_23 = arith.constant 0 : index
    %46 = vector.load %arg10[%c0_22, %c0_23] : memref<1x1xf32, #tpu.memory_space<vmem>>, vector<1x1xf32>
    %47 = vector.shape_cast %24 : vector<8x1xf32> to vector<1x8x1xf32>
    %cst_24 = arith.constant dense<0.000000e+00> : vector<1xf32>
    %48 = vector.multi_reduction <add>, %47, %cst_24 [1, 2] : vector<1x8x1xf32> to vector<1xf32>
    %49 = vector.shape_cast %48 : vector<1xf32> to vector<1x1x1xf32>
    %50 = vector.extract %49[0, 0, 0] : f32 from vector<1x1x1xf32>
    %51 = vector.broadcast %50 : f32 to vector<1x1xf32>
    %52 = arith.addf %46, %51 : vector<1x1xf32>
    %c0_25 = arith.constant 0 : index
    %c0_26 = arith.constant 0 : index
    %53 = vector.load %arg10[%c0_25, %c0_26] : memref<1x1xf32, #tpu.memory_space<vmem>>, vector<1x1xf32>
    tpu.vector_store %arg10[%c0_25, %c0_26], %52 {strides = array<i32>} : memref<1x1xf32, #tpu.memory_space<vmem>>, vector<1x1xf32>,
    %c0_i32_27 = arith.constant 0 : i32
    %54 = arith.cmpi eq, %arg0, %c0_i32_27 : i32
    %55 = arith.extui %54 : i1 to i32
    %c0_i32_28 = arith.constant 0 : i32
    %56 = arith.cmpi ne, %55, %c0_i32_28 : i32
    scf.if %56 {
      %c0_29 = arith.constant 0 : index
      %c0_30 = arith.constant 0 : index
      %57 = vector.load %arg8[%c0_29, %c0_30] : memref<1x8xf32, #tpu.memory_space<vmem>>, vector<1x8xf32>
      %58 = math.log %57 : vector<1x8xf32>
      %cst_31 = arith.constant 14.2857141 : f32
      %59 = vector.broadcast %cst_31 : f32 to vector<1x8xf32>
      %60 = arith.addf %58, %59 : vector<1x8xf32>
      %61 = vector.shape_cast %60 : vector<1x8xf32> to vector<1x1x8xf32>
      %cst_32 = arith.constant dense<0.000000e+00> : vector<1xf32>
      %62 = vector.multi_reduction <add>, %61, %cst_32 [1, 2] : vector<1x1x8xf32> to vector<1xf32>
      %63 = vector.shape_cast %62 : vector<1xf32> to vector<1x1x1xf32>
      %64 = vector.extract %63[0, 0, 0] : f32 from vector<1x1x1xf32>
      %65 = vector.broadcast %64 : f32 to vector<1x1xf32>
      %c0_33 = arith.constant 0 : index
      %c0_34 = arith.constant 0 : index
      %66 = vector.load %arg10[%c0_33, %c0_34] : memref<1x1xf32, #tpu.memory_space<vmem>>, vector<1x1xf32>
      %c0_35 = arith.constant 0 : index
      %c0_36 = arith.constant 0 : index
      %67 = vector.load %arg9[%c0_35, %c0_36] : memref<1x1xf32, #tpu.memory_space<vmem>>, vector<1x1xf32>
      %68 = arith.subf %67, %66 : vector<1x1xf32>
      %cst_37 = arith.constant 1.250000e-01 : f32
      %69 = vector.broadcast %cst_37 : f32 to vector<1x1xf32>
      %70 = arith.mulf %68, %69 : vector<1x1xf32>
      %71 = arith.subf %65, %66 : vector<1x1xf32>
      %cst_38 = arith.constant 1.250000e-01 : f32
      %72 = vector.broadcast %cst_38 : f32 to vector<1x1xf32>
      %73 = arith.mulf %71, %72 : vector<1x1xf32>
      %74 = arith.addf %70, %73 : vector<1x1xf32>
      %cst_39 = arith.constant 5.000000e-01 : f32
      %75 = vector.broadcast %cst_39 : f32 to vector<1x1xf32>
      %76 = arith.mulf %74, %75 : vector<1x1xf32>
      %c0_40 = arith.constant 0 : index
      %c0_41 = arith.constant 0 : index
      %77 = vector.load %arg3[%c0_40, %c0_41] : memref<1x1xf32, #tpu.memory_space<vmem>>, vector<1x1xf32>
      tpu.vector_store %arg3[%c0_40, %c0_41], %76 {strides = array<i32>} : memref<1x1xf32, #tpu.memory_space<vmem>>, vector<1x1xf32>,
    } else {
    }
    return
  }
  func.func @transform_0(%arg0: i32) -> (i32, i32) {
    %c0_i32 = arith.constant 0 : i32
    %c0_i32_0 = arith.constant 0 : i32
    return %arg0, %c0_i32 : i32, i32
  }
  func.func @transform_2(%arg0: i32) -> (i32, i32) {
    %c0_i32 = arith.constant 0 : i32
    %c0_i32_0 = arith.constant 0 : i32
    %c0_i32_1 = arith.constant 0 : i32
    return %c0_i32, %c0_i32_0 : i32, i32
  }
}

</mosaic_0001>

<bundles_post_ra>
// kernel: tpu_custom_call.1
= control target key start
LH: loop header
LB: loop body
LE: loop exit
PB: predicated region body
PF: predicated region fallthrough
CT: control target
= control target key end

     0   :  { %7 = vsyncpa [#allocation10], 0  ;;  %s372_s0 = inlined_call_operand.hbm [shape: f32[8,32], index: 0, kind: input, shape index: {}]   ;;  %s373_s1 = inlined_call_operand.hbm [shape: f32[8,32], index: 1, kind: input, shape index: {}]   ;;  %s374_s2 = inlined_call_operand.hbm [shape: f32[1,1], index: 2, kind: output, shape index: {}]  }
   0x1   :  { %8 = vsyncpa [#allocation11], 0  ;;  %s325_s9 = smov [#allocation9]  }
   0x2   :  { %s15_s10 = sshll.u32 %s325_s9, 4  ;;  %s16_s10 = int_to_ptr.vmem [resolvable:$true] %s15_s10 }
   0x3   :  { %s267_s11 = scalar_lea.vmem %s16_s10, 128  ;;  %p272_p1 = scmp.lt.s32.totalorder %s16_s10, %s16_s10 }
   0x4   :  { %p268_p0 = scmp.ne.s32.totalorder %s16_s10, %s267_s11  ;;  %p273_p2 = scmp.lt.s32.totalorder %s267_s11, %s267_s11 }
   0x6   :  { %p274_p3 = por %p273_p2, %p272_p1 }
   0x8   :  { %p275_p4 = pnand %p274_p3, %p268_p0 }
   0xa   :  { %278 = shalt.err (!%p275_p4)
}
   0xb   :  { %18 = dma.hbm_to_vmem [thread:$0]  %s372_s0, 128, %s16_s10, [#allocation10]  }
   0xc   :  { %319 = dma.done.wait [#allocation10], 128  }
   0xd   :  { %320 = vsyncadd [#allocation10], 4294967168  ;;  %s326_s14 = smov [#allocation2]  }
   0xe   :  { %s34_s15 = sshll.u32 %s326_s14, 4  ;;  %s35_s15 = int_to_ptr.vmem [resolvable:$true] %s34_s15 }
   0xf   :  { %s287_s16 = scalar_lea.vmem %s35_s15, 128  ;;  %p292_p6 = scmp.lt.s32.totalorder %s35_s15, %s35_s15 }
  0x10   :  { %p288_p5 = scmp.ne.s32.totalorder %s35_s15, %s287_s16  ;;  %p293_p7 = scmp.lt.s32.totalorder %s287_s16, %s287_s16 }
  0x12   :  { %p294_p8 = por %p293_p7, %p292_p6 }
  0x14   :  { %p295_p9 = pnand %p294_p8, %p288_p5 }
  0x16   :  { %298 = shalt.err (!%p295_p9)  }
  0x17   :  { %37 = dma.hbm_to_vmem [thread:$0]  %s373_s1, 128, %s35_s15, [#allocation4] }
  0x18   :  { %321 = dma.done.wait [#allocation4], 128 }
  0x19   :  { %322 = vsyncadd [#allocation4], 4294967168  ;;  %v41_v0 = vld [vmem:[#allocation2] sm:$0xff]  ;;  %vm43_vm0 = vcmask 261120   ;;  %v58_v1 = vld [vmem:[#allocation9] sm:$0xff]  ;;  %v327_v6 = vmov 0.0  }
  0x1a   :  { %v42_v2 = vmul.f32 %v41_v0, %v41_v0  ;;  %v59_v3 = vmul.f32 %v58_v1, %v58_v1  ;;  %232 = vmatprep.subr.bf16.mxu0 %v327_v6  ;;  %vm328_vm1 = vmmov 0   ;;  %vm51_vm2 = vcmask 257024   ;;  %s329_s20 = smov [#allocation12]  }
  0x1b   :  { %234 = vmatprep.mubr.msk.bf16.mxu0 %vm328_vm1, %v327_v6  ;;  %vm53_vm3 = vcmask 57344   ;;  %vm130_vm4 = vcmask 64512   ;;  %vm148_vm5 = vcmask 7168   ;;  %vm55_vm6 = vcmask 0   ;;  %s210_s21 = sshll.u32 %s329_s20, 4  ;;  %s211_s21 = int_to_ptr.vmem [resolvable:$true] %s210_s21 }
  0x1c   :  { %v44_v4 = vsel %vm43_vm0, %v42_v2, 0.0  ;;  %v61_v5 = vsel %vm43_vm0, %v59_v3, 0.0  ;;  %54 = vst.msk [vmem:[#allocation6] sm:$0x1] %vm53_vm3, %v327_v6  ;;  %s299_s22 = scalar_lea.vmem %s211_s21, 16  ;;  %s303_s23 = scalar_lea.vmem %s211_s21, 32 }
  0x1d   :  { %45 = vadd.xlane.f32.xlu0 %v44_v4  ;;  %56 = vst.msk [vmem:[#allocation7] sm:$0x1] %vm55_vm6, %v327_v6  ;;  %57 = vst.msk [vmem:[#allocation8] sm:$0x1] %vm55_vm6, %v327_v6  ;;  %p300_p10 = scmp.ne.s32.totalorder %s211_s21, %s299_s22  ;;  %p304_p11 = scmp.lt.s32.totalorder %s211_s21, %s211_s21 }
  0x1e   :  { %p305_p12 = scmp.lt.s32.totalorder %s303_s23, %s299_s22 }
  0x20   :  { %p306_p13 = por %p305_p12, %p304_p11 }
  0x21   :  { %62 = vadd.xlane.f32.xlu0 %v61_v5 }
  0x22   :  { %p307_p0 = pnand %p306_p13, %p300_p10 }
  0x23   :  { %v137_v37 = vld [vmem:[#allocation6] sm:$0x1] }
  0xa6   :  { %v46_v7 = vpop.xlane.xlu0 %45 }
  0xa7   :  { %v47_v8 = vmax.f32 %v46_v7, 1e-16 }
  0xa9   :  { %249 = vrsqrt.f32 %v47_v8 }
  0xaa   :  { %v63_v9 = vpop.xlane.xlu0 %62 }
  0xab   :  { %v64_v10 = vmax.f32 %v63_v9, 1e-16  ;;  %v147_v9 = vld [vmem:[#allocation7] sm:$0x1] }
  0xad   :  { %251 = vrsqrt.f32 %v64_v10  ;;  %v163_v10 = vld [vmem:[#allocation8] sm:$0x1] }
  0xb6   :  { %v250_v11 = vpop.eup %249 }
  0xb7   :  { %v49_v12 = vmul.f32 %v250_v11, %v41_v0 }
  0xb9   :  { %v50_v13 = vpack.c.bf16 %v49_v12, %v49_v12 }
  0xba   :  { %v252_v14 = vpop.eup %251 }
  0xbb   :  { %52 = vst.msk [vmem:[#allocation3] sm:$0xf] %vm51_vm2, %v50_v13  ;;  %v66_v15 = vmul.f32 14.285714, %v252_v14 }
  0xbd   :  { %v67_v18 = vmul.f32 %v66_v15, %v58_v1 }
  0xbf   :  { %v69_v19 = vpack.c.bf16 %v67_v18, %v67_v18 }
  0xc2   :  { %v68_v16 = vld [vmem:[#allocation3] sm:$0xf] }
  0xc3   :  { %v74_v17 = vsel %vm43_vm0, %v68_v16, 0  ;;  %v121_v26 = vld [vmem:[#allocation3] sm:$0xf] }
  0xc4   :  { %233 = vmatpush3.bf16.xpose.msra.mxu0 %v74_v17  ;;  %v122_v27 = vunpack.c.l.bf16 %v121_v26 }
  0xc6   :  { %v123_v30 = vmul.f32 %v122_v27, %v67_v18 }
  0xc8   :  { %v124_v33 = vsel %vm43_vm0, %v123_v30, 0.0 }
  0xcb   :  { %235 = vmatmul.mubr.msk.bf16.vlgmr.msra.gmra.mxu0 %vm43_vm0, %v69_v19 }
 0x18b   :  { %v110_v20 = vpop.f32.mrf.mxu0 }
 0x18c   :  { %v228_v21 = vadd.f32 -14.285714, %v110_v20 }
 0x18d   :  { %v236_v22 = vpop.f32.mrf.mxu0 }
 0x18e   :  { %v128_v23 = vmul.f32 1.442695, %v228_v21 }
 0x18f   :  { %v113_v24 = vpop.f32.mrf.mxu0 }
 0x190   :  { %253 = vpow2.f32 %v128_v23 }
 0x191   :  { %v237_v25 = vpop.f32.mrf.mxu0 }
 0x19d   :  { %v254_v28 = vpop.eup %253 }
 0x19e   :  { %v131_v29 = vsel %vm130_vm4, %v254_v28, 0.0 }
 0x19f   :  { %132 = vadd.xlane.f32.xlu1 %v131_v29  ;;  %v138_v31 = vrot.slane %v131_v29, 4 }
 0x1a1   :  { %v139_v32 = vadd.f32 %v138_v31, %v131_v29 }
 0x1a3   :  { %v140_v34 = vrot.slane %v139_v32, 2  ;;  %125 = vadd.xlane.f32.xlu1 %v124_v33 }
 0x1a5   :  { %v141_v35 = vadd.f32 %v140_v34, %v139_v32 }
 0x1a7   :  { %v142_v36 = vrot.slane %v141_v35, 1 }
 0x1a9   :  { %v143_v38 = vadd.f32 %v142_v36, %v141_v35 }
 0x1ab   :  { %v144_v39 = vadd.f32 %v143_v38, %v137_v37 }
 0x1ad   :  { %146 = vst.msk [vmem:[#allocation6] sm:$0x1] %vm53_vm3, %v144_v39 }
 0x1b4   :  { %v180_v40 = vld [vmem:[#allocation6] sm:$0x1] }
 0x1b5   :  { %255 = vlog2.f32 %v180_v40 }
 0x1c2   :  { %v256_v44 = vpop.eup %255 }
 0x1c3   :  { %v182_v47 = vmul.f32 0.6931472, %v256_v44 }
 0x1c5   :  { %v183_v50 = vadd.f32 14.285714, %v182_v47 }
 0x1c7   :  { %v184_v51 = vsel %vm53_vm3, %v183_v50, 0.0 }
 0x228   :  { %v133_v41 = vpop.xlane.xlu1 %132 }
 0x229   :  { %257 = vlog2.f32 %v133_v41 }
 0x22c   :  { %v126_v42 = vpop.xlane.xlu1 %125 }
 0x22d   :  { %v164_v43 = vsel %vm148_vm5, %v126_v42, 0.0 }
 0x22e   :  { %165 = vadd.xlane.f32.xlu1 %v164_v43 }
 0x236   :  { %v258_v45 = vpop.eup %257 }
 0x237   :  { %v135_v46 = vmul.f32 0.6931472, %v258_v45 }
 0x239   :  { %v136_v48 = vadd.f32 14.285714, %v135_v46 }
 0x23b   :  { %v149_v49 = vsel %vm148_vm5, %v136_v48, 0.0 }
 0x23c   :  { %150 = vadd.xlane.f32.xlu0 %v149_v49 }
 0x240   :  { %185 = vadd.xlane.f32.xlu0 %v184_v51 }
 0x2b7   :  { %v166_v52 = vpop.xlane.xlu1 %165 }
 0x2b8   :  { %v167_v53 = vrot.slane %v166_v52, 4 }
 0x2ba   :  { %v168_v54 = vadd.f32 %v167_v53, %v166_v52 }
 0x2bc   :  { %v169_v55 = vrot.slane %v168_v54, 2 }
 0x2be   :  { %v170_v59 = vadd.f32 %v169_v55, %v168_v54 }
 0x2c0   :  { %v171_v1 = vrot.slane %v170_v59, 1 }
 0x2c2   :  { %v172_v7 = vadd.f32 %v171_v1, %v170_v59 }
 0x2c5   :  { %v151_v56 = vpop.xlane.xlu0 %150 }
 0x2c6   :  { %v152_v57 = vrot.slane %v151_v56, 4 }
 0x2c8   :  { %v153_v58 = vadd.f32 %v152_v57, %v151_v56 }
 0x2c9   :  { %v186_v60 = vpop.xlane.xlu0 %185 }
 0x2ca   :  { %v154_v61 = vrot.slane %v153_v58, 2  ;;  %v187_v62 = vrot.slane %v186_v60, 4 }
 0x2cc   :  { %v188_v63 = vadd.f32 %v187_v62, %v186_v60  ;;  %v155_v0 = vadd.f32 %v154_v61, %v153_v58 }
 0x2ce   :  { %v189_v2 = vrot.slane %v188_v63, 2  ;;  %v156_v3 = vrot.slane %v155_v0, 1 }
 0x2d0   :  { %v190_v4 = vadd.f32 %v189_v2, %v188_v63  ;;  %v157_v5 = vadd.f32 %v156_v3, %v155_v0 }
 0x2d2   :  { %238 = vpush %v157_v5  ;;  %v191_v6 = vrot.slane %v190_v4, 1 }
 0x2d3   :  { %240 = vpush %v172_v7 }
 0x2d4   :  { %v192_v8 = vadd.f32 %v191_v6, %v190_v4 }
 0x2d6   :  { %242 = vpush %v192_v8 }
 0x303   :  { %s239_s0 = spop %238 }
 0x304   :  { %v159_v11 = vstv %s239_s0  ;;  %s241_s1 = spop %240 }
 0x305   :  { %v160_v12 = vadd.f32 %v159_v11, %v147_v9  ;;  %v174_v13 = vstv %s241_s1 }
 0x306   :  { %v175_v14 = vadd.f32 %v174_v13, %v163_v10 }
 0x307   :  { %162 = vst.msk [vmem:[#allocation7] sm:$0x1] %vm55_vm6, %v160_v12  ;;  %s243_s19 = spop %242 }
 0x308   :  { %176 = vst.msk [vmem:[#allocation8] sm:$0x1] %vm55_vm6, %v175_v14  ;;  %v194_v16 = vstv %s243_s19 }
 0x30e   :  { %v196_v15 = vld [vmem:[#allocation7] sm:$0x1] }
 0x30f   :  { %v195_v17 = vld [vmem:[#allocation8] sm:$0x1] }
 0x310   :  { %v197_v18 = vsub.f32 %v196_v15, %v195_v17  ;;  %v199_v19 = vsub.f32 %v194_v16, %v195_v17 }
 0x312   :  { %v198_v20 = vmul.f32 0.125, %v197_v18  ;;  %v200_v21 = vmul.f32 0.125, %v199_v19 }
 0x314   :  { %v201_v22 = vadd.f32 %v200_v21, %v198_v20 }
 0x316   :  { %v202_v23 = vmul.f32 0.5, %v201_v22 }
 0x318   :  { %203 = vst.msk [vmem:[#allocation12] sm:$0x1] %vm55_vm6, %v202_v23 }
 0x319   :  { %310 = shalt.err (!%p307_p0)
}
 0x31a   :  { %213 = dma.vmem_to_hbm [thread:$0]  %s211_s21, 16, %s374_s2, [#allocation11]  }
 0x31b   :  { %323 = dma.done.wait [#allocation11], 16  }
 0x31c   :  { %324 = vsyncadd [#allocation11], 4294967280 }
 0x31d   :  { %217 = vsyncpa [#allocation10], 1 }
 0x31e   :  { %218 = vsyncpa [#allocation11], 1 }
 0x31f   :  { %219 = vsyncmov [#allocation4] }
 0x322   :  { %s220_s26 = vpop.sfrf %219 }
 0x323   :  { %p229_p1 = scmp.ne.s32.totalorder %s220_s26, 0 }
 0x325   :  { %224 = shalt.err (%p229_p1)  }

</bundles_post_ra>
